<compile_context>
chip_gen: v6e
topology: v6e:2x2x1
jax: 0.10.0
libtpu: 0.0.40
codegen_flags: <defaults>
</compile_context>

<pallas_src>
import functools

import jax
import jax.numpy as jnp
from jax import lax
from jax.experimental import pallas as pl
from jax.experimental.pallas import tpu as pltpu

_LANES = 1024          # wide lane-dense output slab (multiple of 128)
_MAX_BLOCK_ROWS = 512  # ~2 MiB f32 per block -> safe on v5e/v6e/v7x VMEM


def _poisson_encode_kernel(seed_ref, x_ref, o_ref, *, scale):
    block_rows, lanes = x_ref.shape
    i = pl.program_id(0)

    # Global element index of every entry in this tile.
    row = lax.broadcasted_iota(jnp.int32, (block_rows, lanes), 0)
    col = lax.broadcasted_iota(jnp.int32, (block_rows, lanes), 1)
    idx = ((i * block_rows + row) * lanes + col).astype(jnp.uint32)

    # Stateless counter-based hash (lowbias32) of (index, seed) -> uniform bits.
    k = idx ^ (seed_ref[0].astype(jnp.uint32) * jnp.uint32(0x9E3779B9))
    k = k ^ (k >> 16)
    k = k * jnp.uint32(0x7FEB352D)
    k = k ^ (k >> 15)
    k = k * jnp.uint32(0x846CA68B)
    k = k ^ (k >> 16)

    # Top 24 bits -> uniform [0, 1).
    u = (k >> 8).astype(jnp.int32).astype(jnp.float32) * jnp.float32(1.0 / (1 << 24))

    # Bernoulli threshold: spike iff u <= x * f_max * dt.
    p = x_ref[...].astype(jnp.float32) * jnp.float32(scale)
    o_ref[...] = (u <= p).astype(o_ref.dtype)


def poisson_encode_step(x, seed, f_max: float = 1000.0, dt: float = 0.001):
    """Pallas equivalent of PoissonEncoderStep(f_max, dt)(x)."""
    orig_shape = x.shape
    dtype = x.dtype
    total = x.size
    scale = float(f_max) * float(dt)

    # Flatten into a lane-dense slab; pad only if the size is not a multiple
    # of the lane width.
    # TODO(synk): mask the tail tile in-kernel to avoid this copy for
    # non-multiple-of-1024 sizes.
    xf = x.reshape(-1)
    pad = (-total) % _LANES
    if pad:
        xf = jnp.pad(xf, (0, pad))
    rows = xf.size // _LANES
    x2 = xf.reshape(rows, _LANES)

    block_rows = min(_MAX_BLOCK_ROWS, rows)
    grid = pl.cdiv(rows, block_rows)

    seed_arr = jnp.asarray([seed], dtype=jnp.int32)
    kernel = functools.partial(_poisson_encode_kernel, scale=scale)

    nbytes = x2.size * x2.dtype.itemsize
    cost = pl.CostEstimate(
        flops=12 * x2.size,
        transcendentals=0,
        bytes_accessed=2 * nbytes,
    )

    out2 = pl.pallas_call(
        kernel,
        out_shape=jax.ShapeDtypeStruct((rows, _LANES), dtype),
        grid_spec=pltpu.PrefetchScalarGridSpec(
            num_scalar_prefetch=1,  # seed lands in SMEM
            grid=(grid,),
            in_specs=[pl.BlockSpec((block_rows, _LANES), lambda i, seed: (i, 0))],
            out_specs=pl.BlockSpec((block_rows, _LANES), lambda i, seed: (i, 0)),
        ),
        compiler_params=pltpu.CompilerParams(
            dimension_semantics=("parallel",),
        ),
        cost_estimate=cost,
    )(seed_arr, x2)

    out = out2.reshape(-1)
    if pad:
        out = out[:total]
    return out.reshape(orig_shape)


class PoissonEncoderStep:
    """JAX/Pallas mirror of the PyTorch module (no parameters)."""

    def __init__(self, f_max: float = 1000.0, dt: float = 0.001):
        self.f_max = f_max
        self.dt = dt

    def __call__(self, x, seed=0):
        return poisson_encode_step(x, seed, f_max=self.f_max, dt=self.dt)


if __name__ == "__main__":
    key = jax.random.PRNGKey(0)
    # Inputs are assumed to lie in [0, 1]; NCHW like the PyTorch module.
    x = jax.random.uniform(key, (2, 4, 16, 16), dtype=jnp.float32)

    enc = PoissonEncoderStep(f_max=1000.0, dt=0.001)
    spikes = enc(x, seed=0)
    spikes = jax.block_until_ready(spikes)

    assert spikes.shape == x.shape
    assert spikes.dtype == x.dtype
    # Output must be binary (0.0 / 1.0).
    assert bool(jnp.all((spikes == 0.0) | (spikes == 1.0)))
    # With f_max*dt = 1, firing probability == x; mean spike rate should be
    # roughly mean(x) (loose statistical sanity check).
    assert abs(float(spikes.mean()) - float(x.mean())) < 0.1

    print("KERNEL_OK")
</pallas_src>

<mosaic_0001>
module attributes {stable_mosaic.version = 11 : i64} {
  func.func @_poisson_encode_kernel(%arg0: i32, %arg1: memref<1xi32, #tpu.memory_space<smem>>, %arg2: memref<2x1024xf32, #tpu.memory_space<vmem>>, %arg3: memref<2x1024xf32, #tpu.memory_space<vmem>>) attributes {dimension_semantics = [#tpu.dimension_semantics<parallel>], iteration_bounds = array<i64: 1>, scalar_prefetch = 1 : i64, scratch_operands = 0 : i64, tpu.core_type = #tpu.core_type<tc>, window_params = [{transform_indices = @transform_0, window_bounds = array<i64: 2, 1024>}, {transform_indices = @transform_1, window_bounds = array<i64: 2, 1024>}]} {
    %0 = tpu.iota {dimensions = array<i32: 0>} : vector<2x1024xi32>
    %1 = tpu.iota {dimensions = array<i32: 1>} : vector<2x1024xi32>
    %c2_i32 = arith.constant 2 : i32
    %2 = arith.muli %arg0, %c2_i32 : i32
    %3 = vector.broadcast %2 : i32 to vector<2x1024xi32>
    %4 = arith.addi %3, %0 : vector<2x1024xi32>
    %c1024_i32 = arith.constant 1024 : i32
    %5 = vector.broadcast %c1024_i32 : i32 to vector<2x1024xi32>
    %6 = arith.muli %4, %5 : vector<2x1024xi32>
    %7 = arith.addi %6, %1 : vector<2x1024xi32>
    %c0 = arith.constant 0 : index
    %8 = memref.load %arg1[%c0] : memref<1xi32, #tpu.memory_space<smem>>
    %c-1640531527_i32 = arith.constant -1640531527 : i32
    %9 = arith.muli %8, %c-1640531527_i32 : i32
    %10 = vector.broadcast %9 : i32 to vector<2x1024xi32>
    %11 = arith.xori %7, %10 : vector<2x1024xi32>
    %c16_i32 = arith.constant 16 : i32
    %12 = vector.broadcast %c16_i32 : i32 to vector<2x1024xi32>
    %13 = arith.shrui %11, %12 : vector<2x1024xi32>
    %14 = arith.xori %11, %13 : vector<2x1024xi32>
    %c2146121005_i32 = arith.constant 2146121005 : i32
    %15 = vector.broadcast %c2146121005_i32 : i32 to vector<2x1024xi32>
    %16 = arith.muli %14, %15 : vector<2x1024xi32>
    %c15_i32 = arith.constant 15 : i32
    %17 = vector.broadcast %c15_i32 : i32 to vector<2x1024xi32>
    %18 = arith.shrui %16, %17 : vector<2x1024xi32>
    %19 = arith.xori %16, %18 : vector<2x1024xi32>
    %c-2073254261_i32 = arith.constant -2073254261 : i32
    %20 = vector.broadcast %c-2073254261_i32 : i32 to vector<2x1024xi32>
    %21 = arith.muli %19, %20 : vector<2x1024xi32>
    %c16_i32_0 = arith.constant 16 : i32
    %22 = vector.broadcast %c16_i32_0 : i32 to vector<2x1024xi32>
    %23 = arith.shrui %21, %22 : vector<2x1024xi32>
    %24 = arith.xori %21, %23 : vector<2x1024xi32>
    %c8_i32 = arith.constant 8 : i32
    %25 = vector.broadcast %c8_i32 : i32 to vector<2x1024xi32>
    %26 = arith.shrui %24, %25 : vector<2x1024xi32>
    %27 = arith.sitofp %26 : vector<2x1024xi32> to vector<2x1024xf32>
    %cst = arith.constant 5.96046448E-8 : f32
    %28 = vector.broadcast %cst : f32 to vector<2x1024xf32>
    %29 = arith.mulf %27, %28 : vector<2x1024xf32>
    %c0_1 = arith.constant 0 : index
    %c0_2 = arith.constant 0 : index
    %30 = vector.load %arg2[%c0_1, %c0_2] : memref<2x1024xf32, #tpu.memory_space<vmem>>, vector<2x1024xf32>
    %cst_3 = arith.constant 1.000000e+00 : f32
    %31 = vector.broadcast %cst_3 : f32 to vector<2x1024xf32>
    %32 = arith.mulf %30, %31 : vector<2x1024xf32>
    %33 = arith.cmpf ole, %29, %32 : vector<2x1024xf32>
    %34 = arith.extui %33 : vector<2x1024xi1> to vector<2x1024xi32>
    %35 = arith.sitofp %34 : vector<2x1024xi32> to vector<2x1024xf32>
    %c0_4 = arith.constant 0 : index
    %c0_5 = arith.constant 0 : index
    %36 = vector.load %arg3[%c0_4, %c0_5] : memref<2x1024xf32, #tpu.memory_space<vmem>>, vector<2x1024xf32>
    tpu.vector_store %arg3[%c0_4, %c0_5], %35 {strides = array<i32>} : memref<2x1024xf32, #tpu.memory_space<vmem>>, vector<2x1024xf32>,
    return
  }
  func.func @transform_0(%arg0: i32, %arg1: memref<1xi32, #tpu.memory_space<smem>>) -> (i32, i32) {
    %c0_i32 = arith.constant 0 : i32
    %c0_i32_0 = arith.constant 0 : i32
    return %arg0, %c0_i32 : i32, i32
  }
  func.func @transform_1(%arg0: i32, %arg1: memref<1xi32, #tpu.memory_space<smem>>) -> (i32, i32) {
    %c0_i32 = arith.constant 0 : i32
    %c0_i32_0 = arith.constant 0 : i32
    return %arg0, %c0_i32 : i32, i32
  }
}

</mosaic_0001>

<bundles_post_ra>
// kernel: tpu_custom_call.1
= control target key start
LH: loop header
LB: loop body
LE: loop exit
PB: predicated region body
PF: predicated region fallthrough
CT: control target
= control target key end

     0   :  { %8 = vsyncpa [#allocation5], 0  ;;  %s396_s0 = inlined_call_operand.<no memory space> [shape: s32[1], index: 0, kind: input, shape index: {}]   ;;  %s397_s1 = inlined_call_operand.hbm [shape: f32[2,1024], index: 1, kind: input, shape index: {}]   ;;  %s398_s2 = inlined_call_operand.hbm [shape: f32[2,1024], index: 2, kind: output, shape index: {}]  }
   0x1   :  { %9 = vsyncpa [#allocation6], 0  ;;  %s334_s9 = smov [#allocation4]  }
   0x2   :  { %s16_s10 = sshll.u32 %s334_s9, 4  ;;  %s17_s10 = int_to_ptr.vmem [resolvable:$true] %s16_s10 }
   0x3   :  { %s298_s11 = scalar_lea.vmem %s17_s10, 256  ;;  %p303_p1 = scmp.lt.s32.totalorder %s17_s10, %s17_s10 }
   0x4   :  { %p299_p0 = scmp.ne.s32.totalorder %s17_s10, %s298_s11  ;;  %p304_p2 = scmp.lt.s32.totalorder %s298_s11, %s298_s11 }
   0x6   :  { %p305_p3 = por %p304_p2, %p303_p1 }
   0x8   :  { %p306_p4 = pnand %p305_p3, %p299_p0 }
   0xa   :  { %309 = shalt.err (!%p306_p4)
}
   0xb   :  { %19 = dma.hbm_to_vmem [thread:$0]  %s397_s1, 256, %s17_s10, [#allocation5]  }
   0xc   :  { %330 = dma.done.wait [#allocation5], 256  }
   0xd   :  { %331 = vsyncadd [#allocation5], 4294967040  ;;  %v23_v0 = vlaneseq  ;;  %s47_s16 = smul.u32 2654435769, %s396_s0  ;;  %v335_v1 = vmov 1983009808  }
   0xe   :  { %v151_v2 = vunpack.c.l.s4 %v335_v1  ;;  %v145_v19 = vld [vmem:[#allocation4] sm:$0xff]  ;;  %v369_v40 = vld [vmem:[#allocation4 + $0x8] sm:$0xff]  ;;  %s337_s0 = smov [#allocation7]  }
   0xf   :  { %v24_v3 = vshrl.u32 %v23_v0, 7  ;;  %v26_v4 = vand.u32 127, %v23_v0  ;;  %v48_v5 = vstv %s47_s16  ;;  %v149_v28 = vcombine.high %v145_v19, %v145_v19  ;;  %s267_s1 = sshll.u32 %s337_s0, 4  ;;  %s268_s1 = int_to_ptr.vmem [resolvable:$true] %s267_s1 }
  0x10   :  { %v152_v6 = vunpack.c.0.s8 %v151_v2  ;;  %v166_v52 = vcombine.high %v369_v40, %v369_v40  ;;  %s310_s17 = scalar_lea.vmem %s268_s1, 256  ;;  %p315_p6 = scmp.lt.s32.totalorder %s268_s1, %s268_s1 }
  0x11   :  { %v27_v7 = vadd.s32 128, %v26_v4  ;;  %v28_v8 = vadd.s32 256, %v26_v4  ;;  %v29_v9 = vadd.s32 384, %v26_v4  ;;  %v37_v10 = vmul.u32 1024, %v24_v3  ;;  %p311_p5 = scmp.ne.s32.totalorder %s268_s1, %s310_s17  ;;  %p316_p7 = scmp.lt.s32.totalorder %s310_s17, %s310_s17 }
  0x12   :  { %v359_v11 = vsub.s32 %v152_v6, %v24_v3  ;;  %v30_v12 = vadd.s32 512, %v26_v4  ;;  %v31_v13 = vadd.s32 640, %v26_v4  ;;  %v32_v14 = vadd.s32 768, %v26_v4 }
  0x13   :  { %v38_v15 = vadd.s32 %v37_v10, %v26_v4  ;;  %v39_v16 = vadd.s32 %v37_v10, %v27_v7  ;;  %v40_v17 = vadd.s32 %v37_v10, %v28_v8  ;;  %v41_v18 = vadd.s32 %v37_v10, %v29_v9  ;;  %p317_p8 = por %p316_p7, %p315_p6 }
  0x14   :  { %v33_v20 = vadd.s32 896, %v26_v4  ;;  %v42_v21 = vadd.s32 %v37_v10, %v30_v12  ;;  %v43_v22 = vadd.s32 %v37_v10, %v31_v13  ;;  %v44_v23 = vadd.s32 %v37_v10, %v32_v14 }
  0x15   :  { %v49_v24 = vxor.u32 %v48_v5, %v38_v15  ;;  %v50_v25 = vxor.u32 %v48_v5, %v39_v16  ;;  %v51_v26 = vxor.u32 %v48_v5, %v40_v17  ;;  %v52_v27 = vxor.u32 %v48_v5, %v41_v18  ;;  %p318_p9 = pnand %p317_p8, %p311_p5 }
  0x16   :  { %v362_v29 = vrot.slane %v145_v19, %v359_v11  ;;  %v45_v30 = vadd.s32 %v37_v10, %v33_v20  ;;  %v53_v31 = vxor.u32 %v48_v5, %v42_v21  ;;  %v365_v36 = vrot.slane %v149_v28, %v359_v11 }
  0x17   :  { %v57_v32 = vshrl.u32 %v49_v24, 16  ;;  %v58_v33 = vshrl.u32 %v50_v25, 16  ;;  %v59_v34 = vshrl.u32 %v51_v26, 16  ;;  %v60_v35 = vshrl.u32 %v52_v27, 16 }
  0x18   :  { %v164_v37 = vcombine.high %v362_v29, %v362_v29  ;;  %v54_v38 = vxor.u32 %v48_v5, %v43_v22  ;;  %v55_v39 = vxor.u32 %v48_v5, %v44_v23  ;;  %v165_v45 = vcombine.high %v365_v36, %v365_v36 }
  0x19   :  { %v65_v41 = vxor.u32 %v57_v32, %v49_v24  ;;  %v66_v42 = vxor.u32 %v58_v33, %v50_v25  ;;  %v67_v43 = vxor.u32 %v59_v34, %v51_v26  ;;  %v68_v44 = vxor.u32 %v60_v35, %v52_v27 }
  0x1a   :  { %v56_v46 = vxor.u32 %v48_v5, %v45_v30  ;;  %v61_v47 = vshrl.u32 %v53_v31, 16  ;;  %v62_v48 = vshrl.u32 %v54_v38, 16  ;;  %v63_v51 = vshrl.u32 %v55_v39, 16 }
  0x1b   :  { %v73_v49 = vmul.u32 2146121005, %v65_v41  ;;  %v74_v50 = vmul.u32 2146121005, %v66_v42 }
  0x1c   :  { %v75_v53 = vmul.u32 2146121005, %v67_v43  ;;  %v76_v54 = vmul.u32 2146121005, %v68_v44  ;;  %v64_v55 = vshrl.u32 %v56_v46, 16  ;;  %v69_v56 = vxor.u32 %v61_v47, %v53_v31 }
  0x1d   :  { %v81_v57 = vshrl.u32 %v73_v49, 15  ;;  %v82_v58 = vshrl.u32 %v74_v50, 15  ;;  %v70_v59 = vxor.u32 %v62_v48, %v54_v38  ;;  %v71_v60 = vxor.u32 %v63_v51, %v55_v39 }
  0x1e   :  { %v83_v61 = vshrl.u32 %v75_v53, 15  ;;  %v84_v62 = vshrl.u32 %v76_v54, 15  ;;  %v72_v63 = vxor.u32 %v64_v55, %v56_v46  ;;  %v77_v0 = vmul.u32 2146121005, %v69_v56 }
  0x1f   :  { %v89_v1 = vxor.u32 %v81_v57, %v73_v49  ;;  %v90_v2 = vxor.u32 %v82_v58, %v74_v50  ;;  %v78_v3 = vmul.u32 2146121005, %v70_v59  ;;  %v79_v4 = vmul.u32 2146121005, %v71_v60 }
  0x20   :  { %v91_v5 = vxor.u32 %v83_v61, %v75_v53  ;;  %v92_v6 = vxor.u32 %v84_v62, %v76_v54  ;;  %v80_v7 = vmul.u32 2146121005, %v72_v63  ;;  %v85_v8 = vshrl.u32 %v77_v0, 15 }
  0x21   :  { %v97_v9 = vmul.u32 2221713035, %v89_v1  ;;  %v98_v10 = vmul.u32 2221713035, %v90_v2  ;;  %v86_v12 = vshrl.u32 %v78_v3, 15  ;;  %v87_v13 = vshrl.u32 %v79_v4, 15 }
  0x22   :  { %v99_v14 = vmul.u32 2221713035, %v91_v5  ;;  %v100_v15 = vmul.u32 2221713035, %v92_v6  ;;  %v88_v16 = vshrl.u32 %v80_v7, 15  ;;  %v93_v17 = vxor.u32 %v85_v8, %v77_v0 }
  0x23   :  { %v105_v18 = vshrl.u32 %v97_v9, 16  ;;  %v106_v19 = vshrl.u32 %v98_v10, 16  ;;  %v94_v20 = vxor.u32 %v86_v12, %v78_v3  ;;  %v95_v21 = vxor.u32 %v87_v13, %v79_v4 }
  0x24   :  { %v107_v22 = vshrl.u32 %v99_v14, 16  ;;  %v108_v23 = vshrl.u32 %v100_v15, 16  ;;  %v96_v24 = vxor.u32 %v88_v16, %v80_v7  ;;  %v101_v25 = vmul.u32 2221713035, %v93_v17 }
  0x25   :  { %v113_v26 = vxor.u32 %v105_v18, %v97_v9  ;;  %v114_v27 = vxor.u32 %v106_v19, %v98_v10  ;;  %v102_v28 = vmul.u32 2221713035, %v94_v20  ;;  %v103_v30 = vmul.u32 2221713035, %v95_v21 }
  0x26   :  { %v115_v31 = vxor.u32 %v107_v22, %v99_v14  ;;  %v116_v32 = vxor.u32 %v108_v23, %v100_v15  ;;  %v104_v33 = vmul.u32 2221713035, %v96_v24  ;;  %v109_v34 = vshrl.u32 %v101_v25, 16 }
  0x27   :  { %v121_v35 = vshrl.u32 %v113_v26, 8  ;;  %v122_v38 = vshrl.u32 %v114_v27, 8  ;;  %v110_v39 = vshrl.u32 %v102_v28, 16  ;;  %v111_v41 = vshrl.u32 %v103_v30, 16 }
  0x28   :  { %v123_v42 = vshrl.u32 %v115_v31, 8  ;;  %v124_v43 = vshrl.u32 %v116_v32, 8  ;;  %v112_v44 = vshrl.u32 %v104_v33, 16  ;;  %v117_v46 = vxor.u32 %v109_v34, %v101_v25 }
  0x29   :  { %v129_v47 = vcvt.s32.f32 %v121_v35  ;;  %v130_v48 = vcvt.s32.f32 %v122_v38  ;;  %v118_v49 = vxor.u32 %v110_v39, %v102_v28  ;;  %v119_v50 = vxor.u32 %v111_v41, %v103_v30 }
  0x2a   :  { %v131_v51 = vcvt.s32.f32 %v123_v42  ;;  %v132_v53 = vcvt.s32.f32 %v124_v43  ;;  %v120_v54 = vxor.u32 %v112_v44, %v104_v33  ;;  %v125_v55 = vshrl.u32 %v117_v46, 8 }
  0x2b   :  { %v137_v56 = vmul.f32 5.9604645e-08, %v129_v47  ;;  %v138_v57 = vmul.f32 5.9604645e-08, %v130_v48  ;;  %v126_v58 = vshrl.u32 %v118_v49, 8  ;;  %v127_v59 = vshrl.u32 %v119_v50, 8 }
  0x2c   :  { %v139_v60 = vmul.f32 5.9604645e-08, %v131_v51  ;;  %v140_v61 = vmul.f32 5.9604645e-08, %v132_v53  ;;  %v128_v62 = vshrl.u32 %v120_v54, 8  ;;  %v133_v63 = vcvt.s32.f32 %v125_v55 }
  0x2d   :  { %vm191_vm0 = vcmp.le.f32.partialorder %v137_v56, %v362_v29  ;;  %vm192_vm1 = vcmp.le.f32.partialorder %v138_v57, %v164_v37  ;;  %v134_v0 = vcvt.s32.f32 %v126_v58  ;;  %v135_v1 = vcvt.s32.f32 %v127_v59 }
  0x2e   :  { %vm193_vm2 = vcmp.le.f32.partialorder %v139_v60, %v365_v36  ;;  %vm194_vm3 = vcmp.le.f32.partialorder %v140_v61, %v165_v45  ;;  %v336_v2 = vmov 0.0   ;;  %v136_v8 = vcvt.s32.f32 %v128_v62 }
  0x2f   :  { %v276_v3 = vsel %vm191_vm0, 1.0, %v336_v2  ;;  %v277_v4 = vsel %vm192_vm1, 1.0, %v336_v2  ;;  %v278_v5 = vsel %vm193_vm2, 1.0, %v336_v2  ;;  %v279_v6 = vsel %vm194_vm3, 1.0, %v336_v2 }
  0x30   :  { %v223_v7 = vcombine.low %v276_v3, %v277_v4  ;;  %v224_v9 = vcombine.low %v278_v5, %v279_v6  ;;  %v141_v10 = vmul.f32 5.9604645e-08, %v133_v63  ;;  %v142_v12 = vmul.f32 5.9604645e-08, %v134_v0 }
  0x31   :  { %v143_v29 = vmul.f32 5.9604645e-08, %v135_v1  ;;  %v144_v13 = vmul.f32 5.9604645e-08, %v136_v8  ;;  %v173_v14 = vrot.slane %v369_v40, %v359_v11  ;;  %v180_v36 = vrot.slane %v166_v52, %v359_v11 }
  0x32   :  { %v231_v37 = vrot.slane %v223_v7, %v359_v11  ;;  %v238_v45 = vrot.slane %v224_v9, %v359_v11 }
  0x33   :  { %v181_v15 = vcombine.high %v173_v14, %v173_v14  ;;  %v182_v16 = vcombine.high %v180_v36, %v180_v36  ;;  %vm195_vm4 = vcmp.le.f32.partialorder %v141_v10, %v173_v14  ;;  %vm197_vm5 = vcmp.le.f32.partialorder %v143_v29, %v180_v36 }
  0x34   :  { %v239_v17 = vcombine.low %v231_v37, %v238_v45  ;;  %v280_v18 = vsel %vm195_vm4, 1.0, %v336_v2  ;;  %v282_v19 = vsel %vm197_vm5, 1.0, %v336_v2 }
  0x35   :  { %vm196_vm6 = vcmp.le.f32.partialorder %v142_v12, %v181_v15  ;;  %vm198_vm7 = vcmp.le.f32.partialorder %v144_v13, %v182_v16 }
  0x36   :  { %259 = vst [vmem:[#allocation7] sm:$0xff] %v239_v17  ;;  %v281_v20 = vsel %vm196_vm6, 1.0, %v336_v2  ;;  %v283_v21 = vsel %vm198_vm7, 1.0, %v336_v2 }
  0x37   :  { %v240_v22 = vcombine.low %v280_v18, %v281_v20  ;;  %v241_v23 = vcombine.low %v282_v19, %v283_v21 }
  0x39   :  { %v248_v40 = vrot.slane %v240_v22, %v359_v11  ;;  %v255_v52 = vrot.slane %v241_v23, %v359_v11 }
  0x3b   :  { %v256_v24 = vcombine.low %v248_v40, %v255_v52 }
  0x3d   :  { %260 = vst [vmem:[#allocation7 + $0x8] sm:$0xff] %v256_v24 }
  0x3e   :  { %321 = shalt.err (!%p318_p9)
}
  0x3f   :  { %270 = dma.vmem_to_hbm [thread:$0]  %s268_s1, 256, %s398_s2, [#allocation6]  }
  0x40   :  { %332 = dma.done.wait [#allocation6], 256  }
  0x41   :  { %333 = vsyncadd [#allocation6], 4294967040 }
  0x42   :  { %274 = vsyncpa [#allocation5], 1 }
  0x43   :  { %275 = vsyncpa [#allocation6], 1 }

</bundles_post_ra>
